<compile_context>
chip_gen: v7x
topology: tpu7x:2x2x1
jax: 0.10.0
libtpu: 0.0.40
codegen_flags: <defaults>
</compile_context>

<pallas_src>
import functools

import jax
import jax.numpy as jnp
from jax.experimental import pallas as pl
from jax.experimental.pallas import tpu as pltpu


def glom_conv2d_kernel(bb, Wimg, w_ref, mask_ref, x_ref, o_ref):
    """One grid step = `bb` images.

    bb       : static images per grid step (Python int)
    Wimg     : static image width (Python int)
    w_ref    : VMEM (Cout, Cin) f32  -- 1x1 conv weight^T, pre-scaled by 1/9
    mask_ref : VMEM (4, HW) f32      -- 0/1 zero-pad masks [+W, -W, +1, -1 valid]
    x_ref    : VMEM (bb, Cin, HW) f32
    o_ref    : VMEM (bb, Cout, HW) f32
    """
    Cin = x_ref.shape[1]
    HW = x_ref.shape[2]

    # Pixels on the 128-lane axis; (bb*Cin) channel rows on sublanes.
    if bb == 1:
        x = x_ref[0]                                  # (Cin, HW)
    else:
        x = x_ref[...].reshape(bb * Cin, HW)          # fill 8 sublanes

    masks = mask_ref[...]                             # (4, HW), loaded once
    m_up, m_dn, m_lf, m_rt = masks[0:1], masks[1:2], masks[2:3], masks[3:4]

    # --- separable 3x3 box-sum with zero padding, on the flat H*W lane axis ---
    # Vertical pass: neighbours are +/- W in flat index space; wrapped rows
    # (first / last image row) are zeroed by the precomputed masks.
    up = pltpu.roll(x, HW - Wimg, axis=1)             # up[i] = x[i + W]
    dn = pltpu.roll(x, Wimg, axis=1)                  # dn[i] = x[i - W]
    rs = x + up * m_up + dn * m_dn
    # Horizontal pass: neighbours are +/- 1; row-boundary wraps zeroed per column.
    lf = pltpu.roll(rs, HW - 1, axis=1)               # lf[i] = rs[i + 1]
    rt = pltpu.roll(rs, 1, axis=1)                    # rt[i] = rs[i - 1]
    pooled = rs + lf * m_lf + rt * m_rt               # (bb*Cin, HW)
    # (AvgPool's 1/9 divisor is folded into w by the wrapper.)

    w = w_ref[...]                                    # (Cout, Cin) in VMEM

    for b in range(bb):
        pb = pooled[b * Cin:(b + 1) * Cin]            # (Cin, HW) static slice

        # --- 1x1 conv (bias=False): dense (Cout, HW) accumulation over Cin ---
        # (Cout,1) weight column x (1,HW) pooled row -> full-slab VPU FMAs.
        acc = w[:, 0:1] * pb[0:1]
        for ci in range(1, Cin):
            acc = acc + w[:, ci:ci + 1] * pb[ci:ci + 1]

        # --- softmax over channels (sublane axis), dense slab math ---
        mx = jnp.max(acc, axis=0, keepdims=True)      # (1, HW)   XLU reduce
        e = jnp.exp(acc - mx)                         # (Cout, HW) one EUP pass
        s = jnp.sum(e, axis=0, keepdims=True)         # (1, HW)   XLU reduce
        out = e * pl.reciprocal(s, approx=True)       # EUP slot, ~free

        # Lane-dense (HW is a multiple of 128) unmasked block store.
        o_ref[b] = out.astype(o_ref.dtype)


def _pick_batch_block(n, cin):
    """Images per grid step: fill the 8 vreg sublanes in the pooling stage when
    N allows it, but keep >= 2 parallel grid steps (v7x has 2 TensorCores)."""
    target = max(1, 8 // max(cin, 1))
    best = 1
    for cand in range(1, min(target, n) + 1):
        if n % cand == 0 and n // cand >= min(2, n):
            best = cand
    return best


def glom_conv2d(x_nchw, w):
    """x_nchw: (N, Cin, H, W) f32; w: (Cin, Cout) f32 -> (N, Cout, H, W) f32.

    AvgPool2d(3, stride=1, pad=1, count_include_pad=True) -> 1x1 conv (no bias)
    -> softmax over channels, matching the PyTorch module defaults.
    """
    N, Cin, H, W = x_nchw.shape
    Cout = w.shape[1]
    HW = H * W

    bb = _pick_batch_block(N, Cin)

    # Free reshape (collapses contiguous minor dims); the op stays one
    # streaming pass over HBM.
    x_flat = x_nchw.reshape(N, Cin, HW)

    # Fold the AvgPool divisor into the conv weight; store as (Cout, Cin) so the
    # kernel reads (Cout, 1) weight columns from VMEM (no SMEM scalar splats).
    # TODO(synk): if the real module uses count_include_pad=False, border pixels
    # need per-pixel divisors (6/4) instead of the folded 1/9.
    w_t = (w.astype(jnp.float32) * jnp.float32(1.0 / 9.0)).T   # (Cout, Cin)

    # Precomputed 0/1 boundary masks for the zero-padded 3x3 window. Batch
    # invariant; passed once with a constant index_map -> no per-step iota /
    # compares / selects inside the kernel.
    idx = jnp.arange(HW, dtype=jnp.int32)
    col = idx % W
    masks = jnp.stack([
        idx < HW - W,        # +W neighbour (row below) inside the image
        idx >= W,            # -W neighbour (row above) inside the image
        col < W - 1,         # +1 neighbour on the same image row
        col > 0,             # -1 neighbour on the same image row
    ]).astype(jnp.float32)   # (4, HW)

    # NOTE: for large images, add an H-tile grid axis with a one-row halo and
    # size blocks to a few MiB (v7x has 64 MiB physical / 32 MiB scoped VMEM),
    # setting vmem_limit_bytes explicitly. At these shapes a full image per
    # step is tiny, so the defaults are fine.
    out_flat = pl.pallas_call(
        functools.partial(glom_conv2d_kernel, bb, W),
        out_shape=jax.ShapeDtypeStruct((N, Cout, HW), x_nchw.dtype),
        grid_spec=pltpu.PrefetchScalarGridSpec(
            num_scalar_prefetch=0,
            grid=(N // bb,),
            in_specs=[
                pl.BlockSpec((Cout, Cin), lambda n: (0, 0)),        # w^T (VMEM)
                pl.BlockSpec((4, HW), lambda n: (0, 0)),            # masks
                pl.BlockSpec((bb, Cin, HW), lambda n: (n, 0, 0)),   # x
            ],
            out_specs=pl.BlockSpec((bb, Cout, HW), lambda n: (n, 0, 0)),
        ),
        compiler_params=pltpu.CompilerParams(
            dimension_semantics=("parallel",)),
    )(w_t, masks, x_flat)

    return out_flat.reshape(N, Cout, H, W)


def ref_glom_conv2d(x, w):
    """Pure-JAX NCHW reference mirroring the PyTorch forward."""
    N, Cin, H, W = x.shape
    xp = jnp.pad(x, ((0, 0), (0, 0), (1, 1), (1, 1)))
    pooled = sum(
        xp[:, :, i:i + H, j:j + W] for i in range(3) for j in range(3)
    ) / 9.0
    logits = jnp.einsum("nchw,cd->ndhw", pooled, w)
    return jax.nn.softmax(logits, axis=1)


if __name__ == "__main__":
    key = jax.random.PRNGKey(0)
    kx, kw = jax.random.split(key)

    N, Cin, Cout, H, W = 2, 4, 8, 16, 16
    x = jax.random.normal(kx, (N, Cin, H, W), dtype=jnp.float32)
    # Conv2d weight (Cout, Cin, 1, 1) squeezed + transposed -> (Cin, Cout),
    # scaled ~1/sqrt(fan_in).
    w = jax.random.normal(kw, (Cin, Cout), dtype=jnp.float32) / jnp.sqrt(
        jnp.float32(Cin))

    out = jax.block_until_ready(glom_conv2d(x, w))
    ref = ref_glom_conv2d(x, w)

    assert out.shape == (N, Cout, H, W)
    # Approx reciprocal in the softmax epilogue -> slightly looser tolerance.
    assert jnp.allclose(out, ref, atol=2e-3, rtol=2e-3), "mismatch vs reference"
    print("KERNEL_OK")
</pallas_src>

<mosaic_0001>
module attributes {stable_mosaic.version = 11 : i64} {
  func.func @glom_conv2d_kernel(%arg0: i32, %arg1: memref<8x4xf32, #tpu.memory_space<vmem>>, %arg2: memref<4x256xf32, #tpu.memory_space<vmem>>, %arg3: memref<1x4x256xf32, #tpu.memory_space<vmem>>, %arg4: memref<1x8x256xf32, #tpu.memory_space<vmem>>) attributes {dimension_semantics = [#tpu.dimension_semantics<parallel>], iteration_bounds = array<i64: 2>, scalar_prefetch = 0 : i64, scratch_operands = 0 : i64, tpu.core_type = #tpu.core_type<tc>, window_params = [{pipeline_mode = #tpu.pipeline_mode<synchronous>, transform_indices = @transform_0, window_bounds = array<i64: 8, 4>}, {pipeline_mode = #tpu.pipeline_mode<synchronous>, transform_indices = @transform_1, window_bounds = array<i64: 4, 256>}, {transform_indices = @transform_2, window_bounds = array<i64: 1, 4, 256>}, {transform_indices = @transform_3, window_bounds = array<i64: 1, 8, 256>}]} {
    %c0 = arith.constant 0 : index
    %c0_0 = arith.constant 0 : index
    %c0_1 = arith.constant 0 : index
    %0 = vector.load %arg3[%c0, %c0_0, %c0_1] : memref<1x4x256xf32, #tpu.memory_space<vmem>>, vector<1x4x256xf32>
    %1 = vector.shape_cast %0 : vector<1x4x256xf32> to vector<4x256xf32>
    %c0_2 = arith.constant 0 : index
    %c0_3 = arith.constant 0 : index
    %2 = vector.load %arg2[%c0_2, %c0_3] : memref<4x256xf32, #tpu.memory_space<vmem>>, vector<4x256xf32>
    %3 = vector.extract_strided_slice %2 {offsets = [0, 0], sizes = [1, 256], strides = [1, 1]} : vector<4x256xf32> to vector<1x256xf32>
    %4 = vector.extract_strided_slice %2 {offsets = [1, 0], sizes = [1, 256], strides = [1, 1]} : vector<4x256xf32> to vector<1x256xf32>
    %5 = vector.extract_strided_slice %2 {offsets = [2, 0], sizes = [1, 256], strides = [1, 1]} : vector<4x256xf32> to vector<1x256xf32>
    %6 = vector.extract_strided_slice %2 {offsets = [3, 0], sizes = [1, 256], strides = [1, 1]} : vector<4x256xf32> to vector<1x256xf32>
    %c240_i32 = arith.constant 240 : i32
    %7 = tpu.dynamic_rotate %1 by %c240_i32 dim 1 : vector<4x256xf32>, i32 -> vector<4x256xf32>
    %c16_i32 = arith.constant 16 : i32
    %8 = tpu.dynamic_rotate %1 by %c16_i32 dim 1 : vector<4x256xf32>, i32 -> vector<4x256xf32>
    %9 = vector.broadcast %3 : vector<1x256xf32> to vector<4x256xf32>
    %10 = arith.mulf %7, %9 : vector<4x256xf32>
    %11 = arith.addf %1, %10 : vector<4x256xf32>
    %12 = vector.broadcast %4 : vector<1x256xf32> to vector<4x256xf32>
    %13 = arith.mulf %8, %12 : vector<4x256xf32>
    %14 = arith.addf %11, %13 : vector<4x256xf32>
    %c255_i32 = arith.constant 255 : i32
    %15 = tpu.dynamic_rotate %14 by %c255_i32 dim 1 : vector<4x256xf32>, i32 -> vector<4x256xf32>
    %c1_i32 = arith.constant 1 : i32
    %16 = tpu.dynamic_rotate %14 by %c1_i32 dim 1 : vector<4x256xf32>, i32 -> vector<4x256xf32>
    %17 = vector.broadcast %5 : vector<1x256xf32> to vector<4x256xf32>
    %18 = arith.mulf %15, %17 : vector<4x256xf32>
    %19 = arith.addf %14, %18 : vector<4x256xf32>
    %20 = vector.broadcast %6 : vector<1x256xf32> to vector<4x256xf32>
    %21 = arith.mulf %16, %20 : vector<4x256xf32>
    %22 = arith.addf %19, %21 : vector<4x256xf32>
    %c0_4 = arith.constant 0 : index
    %c0_5 = arith.constant 0 : index
    %23 = vector.load %arg1[%c0_4, %c0_5] : memref<8x4xf32, #tpu.memory_space<vmem>>, vector<8x4xf32>
    %24 = vector.extract_strided_slice %23 {offsets = [0, 0], sizes = [8, 1], strides = [1, 1]} : vector<8x4xf32> to vector<8x1xf32>
    %25 = vector.extract_strided_slice %22 {offsets = [0, 0], sizes = [1, 256], strides = [1, 1]} : vector<4x256xf32> to vector<1x256xf32>
    %26 = vector.broadcast %24 : vector<8x1xf32> to vector<8x256xf32>
    %27 = vector.broadcast %25 : vector<1x256xf32> to vector<8x256xf32>
    %28 = arith.mulf %26, %27 : vector<8x256xf32>
    %29 = vector.extract_strided_slice %23 {offsets = [0, 1], sizes = [8, 1], strides = [1, 1]} : vector<8x4xf32> to vector<8x1xf32>
    %30 = vector.extract_strided_slice %22 {offsets = [1, 0], sizes = [1, 256], strides = [1, 1]} : vector<4x256xf32> to vector<1x256xf32>
    %31 = vector.broadcast %29 : vector<8x1xf32> to vector<8x256xf32>
    %32 = vector.broadcast %30 : vector<1x256xf32> to vector<8x256xf32>
    %33 = arith.mulf %31, %32 : vector<8x256xf32>
    %34 = arith.addf %28, %33 : vector<8x256xf32>
    %35 = vector.extract_strided_slice %23 {offsets = [0, 2], sizes = [8, 1], strides = [1, 1]} : vector<8x4xf32> to vector<8x1xf32>
    %36 = vector.extract_strided_slice %22 {offsets = [2, 0], sizes = [1, 256], strides = [1, 1]} : vector<4x256xf32> to vector<1x256xf32>
    %37 = vector.broadcast %35 : vector<8x1xf32> to vector<8x256xf32>
    %38 = vector.broadcast %36 : vector<1x256xf32> to vector<8x256xf32>
    %39 = arith.mulf %37, %38 : vector<8x256xf32>
    %40 = arith.addf %34, %39 : vector<8x256xf32>
    %41 = vector.extract_strided_slice %23 {offsets = [0, 3], sizes = [8, 1], strides = [1, 1]} : vector<8x4xf32> to vector<8x1xf32>
    %42 = vector.extract_strided_slice %22 {offsets = [3, 0], sizes = [1, 256], strides = [1, 1]} : vector<4x256xf32> to vector<1x256xf32>
    %43 = vector.broadcast %41 : vector<8x1xf32> to vector<8x256xf32>
    %44 = vector.broadcast %42 : vector<1x256xf32> to vector<8x256xf32>
    %45 = arith.mulf %43, %44 : vector<8x256xf32>
    %46 = arith.addf %40, %45 : vector<8x256xf32>
    %cst = arith.constant dense<0xFF800000> : vector<256xf32>
    %47 = vector.multi_reduction <maximumf>, %46, %cst [0] : vector<8x256xf32> to vector<256xf32>
    %48 = vector.shape_cast %47 : vector<256xf32> to vector<1x256xf32>
    %49 = vector.broadcast %48 : vector<1x256xf32> to vector<8x256xf32>
    %50 = arith.subf %46, %49 : vector<8x256xf32>
    %51 = math.exp %50 : vector<8x256xf32>
    %cst_6 = arith.constant dense<0.000000e+00> : vector<256xf32>
    %52 = vector.multi_reduction <add>, %51, %cst_6 [0] : vector<8x256xf32> to vector<256xf32>
    %53 = vector.shape_cast %52 : vector<256xf32> to vector<1x256xf32>
    %54 = tpu.reciprocal %53 {approx = true} : vector<1x256xf32> -> vector<1x256xf32>
    %55 = vector.broadcast %54 : vector<1x256xf32> to vector<8x256xf32>
    %56 = arith.mulf %51, %55 : vector<8x256xf32>
    %c0_7 = arith.constant 0 : index
    %c0_8 = arith.constant 0 : index
    %c0_9 = arith.constant 0 : index
    %57 = vector.load %arg4[%c0_7, %c0_8, %c0_9] : memref<1x8x256xf32, #tpu.memory_space<vmem>>, vector<1x8x256xf32>
    %58 = vector.shape_cast %57 : vector<1x8x256xf32> to vector<8x256xf32>
    %59 = vector.shape_cast %56 : vector<8x256xf32> to vector<1x8x256xf32>
    tpu.vector_store %arg4[%c0_7, %c0_8, %c0_9], %59 {strides = array<i32>} : memref<1x8x256xf32, #tpu.memory_space<vmem>>, vector<1x8x256xf32>,
    return
  }
  func.func @transform_0(%arg0: i32) -> (i32, i32) {
    %c0_i32 = arith.constant 0 : i32
    %c0_i32_0 = arith.constant 0 : i32
    %c0_i32_1 = arith.constant 0 : i32
    return %c0_i32, %c0_i32_0 : i32, i32
  }
  func.func @transform_1(%arg0: i32) -> (i32, i32) {
    %c0_i32 = arith.constant 0 : i32
    %c0_i32_0 = arith.constant 0 : i32
    %c0_i32_1 = arith.constant 0 : i32
    return %c0_i32, %c0_i32_0 : i32, i32
  }
  func.func @transform_2(%arg0: i32) -> (i32, i32, i32) {
    %c0_i32 = arith.constant 0 : i32
    %c0_i32_0 = arith.constant 0 : i32
    %c0_i32_1 = arith.constant 0 : i32
    return %arg0, %c0_i32, %c0_i32_0 : i32, i32, i32
  }
  func.func @transform_3(%arg0: i32) -> (i32, i32, i32) {
    %c0_i32 = arith.constant 0 : i32
    %c0_i32_0 = arith.constant 0 : i32
    %c0_i32_1 = arith.constant 0 : i32
    return %arg0, %c0_i32, %c0_i32_0 : i32, i32, i32
  }
}

</mosaic_0001>

<bundles_post_ra>
// kernel: tpu_custom_call.1
= control target key start
LH: loop header
LB: loop body
LE: loop exit
PB: predicated region body
PF: predicated region fallthrough
CT: control target
= control target key end

     0   :  { %8 = vsyncpa [#allocation3], 0  ;;  %s939_s0 = inlined_call_operand.vmem [shape: f32[8,4], index: 0, kind: input, shape index: {}]   ;;  %s940_s1 = inlined_call_operand.hbm [shape: f32[4,256], index: 1, kind: input, shape index: {}]   ;;  %s941_s2 = inlined_call_operand.vmem [shape: f32[2,4,256], index: 2, kind: input, shape index: {}]   ;;  %s942_s3 = inlined_call_operand.hbm [shape: f32[2,8,256], index: 3, kind: output, shape index: {}]  }
   0x1   :  { %9 = vsyncpa [#allocation4], 0 }
   0x2   :  { %11 = vsyncpa [#allocation4 + $0x1], 0  ;;  %s761_s12 = smov 0   ;;  %s763_s13 = smov 0  }
   0x3   :  { %s765_s14 = smov 0   ;;  %s767_s15 = smov 0  }
   0x4 LB: > { %s782_s16 = sadd.s32 4294967295, %s729_s15   ;;  %s548_s17 = sadd.s32 4294967294, %s729_s15   ;;  %s729_s15 = sphi %s767_s15, %s958_s15   ;;  %s725_s14 = sphi %s765_s14, %s957_s14   ;;  %s721_s13 = sphi %s763_s13, %s956_s13   ;;  %s717_s12 = sphi %s761_s12, %s955_s12  }
   0x5   : > { %s786_s18 = sadd.s32 1, %s729_s15   ;;  %s92_s19 = sadd.s32 1, %s725_s14 }
   0x6   : > { %s89_s20 = ssub.s32 %s729_s15, %s786_s18  ;;  %p102_p0 = scmp.ne.s32.totalorder %s725_s14, %s721_s13 }
   0x7   : > { %p90_p1 = scmp.eq.s32.totalorder %s89_s20, 0  ;;  %p103_p2 = scmp.eq.s32.totalorder %s782_s16, 1 }
   0x8   : > { %p108_p3 = scmp.ne.s32.totalorder %s721_s13, %s717_s12  ;;  %p109_p4 = scmp.eq.s32.totalorder %s548_s17, 1 }
   0x9   : > { %s797_s21 = scalar_select %p90_p1, %s725_s14, %s92_s19  }
   0xa   : > { %p799_p5 = por %p103_p2, %p102_p0  ;;  %p803_p6 = por %p109_p4, %p108_p3 }
   0xb   : > { %p549_p7 = scmp.ge.s32.totalorder %s729_s15, 1  ;;  %p116_p8 = scmp.lt.s32.totalorder %s729_s15, 3 }
   0xc   : > { %s946_s22 = scalar_select %p799_p5, 1, 0 }
   0xd   : > { %s947_s23 = scalar_select %p803_p6, 1, 0 }
   0xe   : > { %p943_p9 = scmp.eq.s32.totalorder %s782_s16, 0  ;;  %p810_p10 = pnand %p549_p7, %p116_p8 }
   0xf   : > { %s731_s25 = smov [#allocation2]   ;;  %s635_s30 = scalar_lea.hbm %s940_s1, 128 }
  0x10   : > { %s948_s24 = scalar_select %p810_p10, 1, 0 }
  0x11   : > { %s132_s26 = sshll.u32 %s731_s25, 4  ;;  %p570_p11 = pneg %p810_p10  ;;  %s133_s26 = int_to_ptr.vmem [resolvable:$true] %s132_s26 }
  0x12   : > { %p636_p13 = scmp.ne.s32.totalorder %s940_s1, %s635_s30  ;;  %p642_p3 = scmp.lt.u32.totalorder %s635_s30, %s940_s1 }
  0x13   : > { %p818_p12 = pnand %p943_p9, %p570_p11 }
  0x15   : > { %p637_p0 = pneg %p818_p12 }
  0x17   : > { %p638_p1 = pnand %p637_p0, %p636_p13 }
  0x19   : > { %p639_p2 = pneg %p638_p1 }
  0x1b   : > { %p644_p4 = pnand %p642_p3, %p639_p2 }
  0x1d   : > { %647 = shalt.err (!%p644_p4)
}
  0x1e   : > { %s648_s8 = scalar_lea.vmem %s133_s26, 128  ;;  %p656_p9 = scmp.lt.s32.totalorder %s133_s26, %s133_s26 }
  0x1f   : > { %p649_p7 = scmp.ne.s32.totalorder %s133_s26, %s648_s8  ;;  %p657_p6 = scmp.lt.s32.totalorder %s648_s8, %s648_s8 }
  0x21   : > { %p651_p8 = pnand %p649_p7, %p637_p0  ;;  %p658_p5 = por %p657_p6, %p656_p9 }
  0x23   : > { %p652_p11 = pneg %p651_p8 }
  0x25   : > { %p659_p10 = pnand %p658_p5, %p652_p11 }
  0x27   : > { %662 = shalt.err (!%p659_p10)
}
  0x28   : > { %573 = dma.hbm_to_vmem [thread:$0]  (!%p818_p12), %s940_s1, 128, %s133_s26, [#allocation3]  }
  0x29   : > { %p950_p13 = scmp.ne.s32.totalorder %s948_s24, 0 }
  0x2a   : > { %p951_p1 = scmp.eq.s32.totalorder (!%p950_p13), %s782_s16, 0 }
  0x2b   : > { %153 = sbr.rel (%p950_p13) target bundleno = 402 (0x192), region = 32 }
  0x32   : > { %708 = dma.done.wait (%p951_p1), [#allocation3], 128   ;;  %p952_p0 = pmov %p951_p1 }
  0x33   : > { %p177_p6 = scmp.lt.s32.totalorder %s782_s16, 1  ;;  %s732_s26 = smov 16   ;;  %v734_v2 = vmov 0   ;;  %v735_v3 = vmov 1   ;;  %v191_v4 = vlaneseq  ;;  %v183_v10 = vld [vmem:[#allocation2] sm:$0xff]  ;;  %v321_v37 = vld [vmem:[%s939_s0] sm:$0xff] }
  0x34   : > { %710 = vsyncadd (%p952_p0), [#allocation3], 4294967168  ;;  %s733_s24 = smov 112   ;;  %622 = vset.pattern.permute.xlu0 %v734_v2  ;;  %623 = vset.pattern.permute.xlu1 %v735_v3  ;;  %s736_s27 = smov 127   ;;  %v738_v38 = vmov 3   ;;  %v739_v39 = vmov 2  }
  0x35   : > { %s178_s11 = scalar_select %p177_p6, %s782_s16, 1  ;;  %v849_v5 = vshrl.u32 %v191_v4, 7  ;;  %v859_v11 = vand.u32 127, %v191_v4 }
  0x36   : > { %s737_s28 = smov 1   ;;  %s174_s4 = sand.u32 1, %s721_s13  }
  0x37   : > { %s562_s17 = sshll.u32 %s178_s11, 3  ;;  %v852_v6 = vsub.s32 1, %v849_v5  ;;  %v235_v7 = vsub.s32 5, %v849_v5  ;;  %v856_v8 = vsub.s32 0, %v849_v5  ;;  %v210_v9 = vsub.s32 4, %v849_v5  ;;  %s554_s5 = sshll.u32 %s174_s4, 4 }
  0x38   : > { %s181_s25 = scalar_lea.vmem %s941_s2, %s562_s17  ;;  %vm200_vm0 = vcmp.lt.s32.totalorder %v859_v11, 16  ;;  %vm193_vm1 = vcmp.lt.s32.totalorder %v859_v11, 112  ;;  %v273_v40 = vsub.s32 2, %v849_v5  ;;  %v277_v41 = vsub.s32 6, %v849_v5  ;;  %s563_s6 = sshll.u32 %s782_s16, 8 }
  0x39   : > { %v182_v0 = vld [vmem:[%s181_s25] sm:$0xff]  ;;  %v232_v12 = vrot.slane %v183_v10, %v852_v6  ;;  %v236_v13 = vrot.slane %v183_v10, %v235_v7  ;;  %v207_v14 = vrot.slane %v183_v10, %v856_v8  ;;  %v211_v15 = vrot.slane %v183_v10, %v210_v9  ;;  %s176_s7 = scalar_lea.vmem [#allocation5], %s554_s5  ;;  %s897_s11 = scalar_lea.hbm %s942_s3, %s563_s6 }
  0x3a   : > { %196 = vrot.lane.b32.xlu1 %v182_v0, %s732_s26  ;;  %187 = vrot.lane.b32.xlu0 %v182_v0, %s733_s24  ;;  %v185_v1 = vcombine.high %v182_v0, %v182_v0  ;;  %v298_v42 = vsub.s32 3, %v849_v5  ;;  %v302_v43 = vsub.s32 7, %v849_v5  ;;  %v274_v44 = vrot.slane %v183_v10, %v273_v40  ;;  %s477_s8 = sshll.u32 %s176_s7, 4  ;;  %s463_s17 = scalar_lea.sflag [#allocation4], %s174_s4  ;;  %s899_s8 = int_to_ptr.vmem [resolvable:$true] %s477_s8 }
  0x3b   : > { %v242_v18 = vrot.slane %v232_v12, %v852_v6  ;;  %v246_v19 = vrot.slane %v236_v13, %v852_v6  ;;  %v217_v20 = vrot.slane %v207_v14, %v856_v8  ;;  %v221_v21 = vrot.slane %v211_v15, %v856_v8  ;;  %s663_s16 = scalar_lea.vmem %s899_s8, 256  ;;  %p953_p9 = scmp.ne.s32.totalorder %s946_s22, 0 }
  0x3c   : > { %v278_v45 = vrot.slane %v183_v10, %v277_v41  ;;  %vm261_vm2 = vcmp.lt.s32.totalorder %v859_v11, 127  ;;  %v299_v47 = vrot.slane %v183_v10, %v298_v42  ;;  %v303_v48 = vrot.slane %v183_v10, %v302_v43  ;;  %p664_p5 = scmp.ne.s32.totalorder %s899_s8, %s663_s16  ;;  %s740_s19 = smov [#allocation5]  }
  0x3d   : > { %v284_v49 = vrot.slane %v274_v44, %v273_v40  ;;  %vm268_vm3 = vcmp.lt.s32.totalorder %v859_v11, 1  ;;  %s667_s20 = sshll.u32 %s740_s19, 4  ;;  %s668_s20 = int_to_ptr.vmem [resolvable:$false] %s667_s20 }
  0x3e   : > { %198 = vrot.lane.b32.xlu1 %v185_v1, %s732_s26  ;;  %189 = vrot.lane.b32.xlu0 %v185_v1, %s733_s24  ;;  %v288_v50 = vrot.slane %v278_v45, %v273_v40  ;;  %v309_v54 = vrot.slane %v299_v47, %v298_v42  ;;  %v313_v55 = vrot.slane %v303_v48, %v298_v42  ;;  %p665_p10 = pnand %p664_p5, %p953_p9  ;;  %s669_s25 = scalar_lea.vmem %s668_s20, 512 }
  0x3f   : > { %p670_p2 = scmp.lt.s32.totalorder %s899_s8, %s668_s20  ;;  %p671_p3 = scmp.lt.s32.totalorder %s669_s25, %s663_s16 }
  0x40   : > { %p666_p12 = pneg %p665_p10 }
  0x41   : > { %p672_p4 = por %p671_p3, %p670_p2 }
  0x43   : > { %p673_p7 = pnand %p672_p4, %p666_p12 }
  0xac   : > { %v197_v16 = vpop.permute.xlu1 %196  ;;  %v188_v17 = vpop.permute.xlu0 %187 }
  0xb0   : > { %v199_v22 = vpop.permute.xlu1 %198  ;;  %v190_v23 = vpop.permute.xlu0 %189 }
  0xb1   : > { %v201_v24 = vsel %vm200_vm0, %v197_v16, %v199_v22  ;;  %v202_v25 = vsel %vm200_vm0, %v199_v22, %v197_v16  ;;  %v194_v26 = vsel %vm193_vm1, %v188_v17, %v190_v23  ;;  %v195_v27 = vsel %vm193_vm1, %v190_v23, %v188_v17 }
  0xb2   : > { %v247_v28 = vmul.f32 %v242_v18, %v202_v25  ;;  %v248_v29 = vmul.f32 %v246_v19, %v201_v24  ;;  %v222_v30 = vmul.f32 %v217_v20, %v194_v26  ;;  %v223_v31 = vmul.f32 %v221_v21, %v195_v27 }
  0xb4   : > { %v226_v32 = vcombine.low %v222_v30, %v223_v31  ;;  %v251_v33 = vcombine.low %v247_v28, %v248_v29 }
  0xb6   : > { %v228_v34 = vadd.f32 %v226_v32, %v182_v0 }
  0xb8   : > { %v253_v35 = vadd.f32 %v251_v33, %v228_v34 }
  0xba   : > { %257 = vrot.lane.b32.xlu0 %v253_v35, %s736_s27  ;;  %v255_v36 = vcombine.high %v253_v35, %v253_v35 }
  0xbc   : > { %259 = vrot.lane.b32.xlu1 %v255_v36, %s736_s27 }
  0xbe   : > { %264 = vrot.lane.b32.xlu0 %v253_v35, %s737_s28 }
  0xc0   : > { %266 = vrot.lane.b32.xlu1 %v255_v36, %s737_s28 }
  0xc2   : > { %324 = vperm.xlu0 %622, %v321_v37  }
  0xc4   : > { %349 = vperm.xlu1 %623, %v321_v37  }
  0xc6   : > { %625 = vset.pattern.permute.xlu0 %v738_v38 }
  0xc7   : > { %401 = vperm.xlu0 %625, %v321_v37  }
  0xc8   : > { %624 = vset.pattern.permute.xlu1 %v739_v39 }
  0xc9   : > { %375 = vperm.xlu1 %624, %v321_v37  }
 0x12c   : > { %v258_v46 = vpop.permute.xlu0 %257 }
 0x12e   : > { %v260_v51 = vpop.permute.xlu1 %259 }
 0x12f   : > { %v262_v52 = vsel %vm261_vm2, %v258_v46, %v260_v51  ;;  %v263_v53 = vsel %vm261_vm2, %v260_v51, %v258_v46 }
 0x130   : > { %v289_v56 = vmul.f32 %v284_v49, %v262_v52  ;;  %v290_v57 = vmul.f32 %v288_v50, %v263_v53  ;;  %v265_v58 = vpop.permute.xlu0 %264 }
 0x132   : > { %v267_v59 = vpop.permute.xlu1 %266  ;;  %v293_v0 = vcombine.low %v289_v56, %v290_v57 }
 0x133   : > { %v269_v60 = vsel %vm268_vm3, %v265_v58, %v267_v59  ;;  %v270_v61 = vsel %vm268_vm3, %v267_v59, %v265_v58 }
 0x134   : > { %v314_v62 = vmul.f32 %v309_v54, %v270_v61  ;;  %v315_v63 = vmul.f32 %v313_v55, %v269_v60  ;;  %v295_v2 = vadd.f32 %v293_v0, %v253_v35 }
 0x136   : > { %v318_v1 = vcombine.low %v314_v62, %v315_v63 }
 0x138   : > { %v320_v3 = vadd.f32 %v318_v1, %v295_v2 }
 0x13a   : > { %v355_v4 = vrot.slane %v320_v3, %v852_v6  ;;  %v359_v10 = vrot.slane %v320_v3, %v235_v7  ;;  %v331_v11 = vrot.slane %v320_v3, %v856_v8  ;;  %v335_v12 = vrot.slane %v320_v3, %v210_v9 }
 0x13b   : > { %v381_v17 = vrot.slane %v320_v3, %v273_v40  ;;  %v385_v18 = vrot.slane %v320_v3, %v277_v41  ;;  %v407_v19 = vrot.slane %v320_v3, %v298_v42  ;;  %v411_v20 = vrot.slane %v320_v3, %v302_v43 }
 0x13c   : > { %v365_v14 = vrot.slane %v355_v4, %v852_v6  ;;  %v369_v15 = vrot.slane %v359_v10, %v852_v6  ;;  %v341_v21 = vrot.slane %v331_v11, %v856_v8  ;;  %v345_v22 = vrot.slane %v335_v12, %v856_v8 }
 0x13d   : > { %v391_v5 = vrot.slane %v381_v17, %v273_v40  ;;  %v395_v9 = vrot.slane %v385_v18, %v273_v40  ;;  %v417_v27 = vrot.slane %v407_v19, %v298_v42  ;;  %v421_v28 = vrot.slane %v411_v20, %v298_v42 }
 0x141   : > { %v325_v13 = vpop.permute.xlu0 %324 }
 0x142   : > { %v346_v24 = vmul.f32 %v341_v21, %v325_v13  ;;  %v347_v25 = vmul.f32 %v345_v22, %v325_v13 }
 0x143   : > { %v350_v16 = vpop.permute.xlu1 %349 }
 0x144   : > { %v370_v7 = vmul.f32 %v365_v14, %v350_v16  ;;  %v371_v23 = vmul.f32 %v369_v15, %v350_v16 }
 0x146   : > { %v402_v26 = vpop.permute.xlu0 %401  ;;  %v372_v6 = vadd.f32 %v370_v7, %v346_v24  ;;  %v373_v30 = vadd.f32 %v371_v23, %v347_v25 }
 0x147   : > { %v422_v33 = vmul.f32 %v417_v27, %v402_v26  ;;  %v423_v34 = vmul.f32 %v421_v28, %v402_v26 }
 0x148   : > { %v376_v29 = vpop.permute.xlu1 %375 }
 0x149   : > { %v396_v31 = vmul.f32 %v391_v5, %v376_v29  ;;  %v397_v32 = vmul.f32 %v395_v9, %v376_v29 }
 0x14b   : > { %v398_v35 = vadd.f32 %v396_v31, %v372_v6  ;;  %v399_v36 = vadd.f32 %v397_v32, %v373_v30 }
 0x14d   : > { %v424_v37 = vadd.f32 %v422_v33, %v398_v35  ;;  %v425_v8 = vadd.f32 %v423_v34, %v399_v36 }
 0x14f   : > { %v426_v38 = vrot.slane %v424_v37, 4  ;;  %v432_v39 = vrot.slane %v425_v8, 4 }
 0x151   : > { %v427_v41 = vmax.f32 %v424_v37, %v426_v38  ;;  %v433_v43 = vmax.f32 %v425_v8, %v432_v39 }
 0x153   : > { %v428_v44 = vrot.slane %v427_v41, 2  ;;  %v434_v40 = vrot.slane %v433_v43, 2 }
 0x155   : > { %v429_v45 = vmax.f32 %v427_v41, %v428_v44  ;;  %v435_v46 = vmax.f32 %v433_v43, %v434_v40 }
 0x157   : > { %v430_v42 = vrot.slane %v429_v45, 1  ;;  %v436_v47 = vrot.slane %v435_v46, 1 }
 0x159   : > { %v431_v48 = vmax.f32 %v429_v45, %v430_v42  ;;  %v437_v49 = vmax.f32 %v435_v46, %v436_v47 }
 0x15b   : > { %v438_v50 = vsub.f32 %v424_v37, %v431_v48  ;;  %v439_v51 = vsub.f32 %v425_v8, %v437_v49 }
 0x15d   : > { %v440_v52 = vmul.f32 1.442695, %v438_v50  ;;  %v442_v53 = vmul.f32 1.442695, %v439_v51 }
 0x15f   : > { %627 = vpow2.f32 %v440_v52 }
 0x160   : > { %629 = vpow2.f32 %v442_v53 }
 0x169   : > { %v628_v54 = vpop.eup %627 }
 0x16a   : > { %v630_v55 = vpop.eup %629  ;;  %v444_v56 = vrot.slane %v628_v54, 4 }
 0x16b   : > { %v450_v57 = vrot.slane %v630_v55, 4 }
 0x16c   : > { %v445_v58 = vadd.f32 %v628_v54, %v444_v56 }
 0x16d   : > { %v451_v59 = vadd.f32 %v630_v55, %v450_v57 }
 0x16e   : > { %v446_v60 = vrot.slane %v445_v58, 2 }
 0x16f   : > { %v452_v61 = vrot.slane %v451_v59, 2 }
 0x170   : > { %v447_v62 = vadd.f32 %v446_v60, %v445_v58 }
 0x171   : > { %v453_v63 = vadd.f32 %v452_v61, %v451_v59 }
 0x172   : > { %v448_v0 = vrot.slane %v447_v62, 1 }
 0x173   : > { %v454_v1 = vrot.slane %v453_v63, 1 }
 0x174   : > { %v449_v2 = vadd.f32 %v448_v0, %v447_v62 }
 0x175   : > { %v455_v3 = vadd.f32 %v454_v1, %v453_v63 }
 0x176   : > { %631 = vrcp.f32 %v449_v2 }
 0x177   : > { %633 = vrcp.f32 %v455_v3 }
 0x180   : > { %v632_v4 = vpop.eup %631 }
 0x181   : > { %v634_v10 = vpop.eup %633  ;;  %v458_v11 = vmul.f32 %v632_v4, %v628_v54 }
 0x182   : > { %v459_v12 = vmul.f32 %v634_v10, %v630_v55 }
 0x183   : > { %460 = vst [vmem:[%s176_s7] sm:$0xff] %v458_v11 }
 0x184   : > { %461 = vst [vmem:[%s176_s7 + $0x8] sm:$0xff] %v459_v12 }
 0x185   : > { %676 = shalt.err (!%p673_p7)
}
 0x186   : > { %s677_s26 = scalar_lea.hbm %s897_s11, 256  ;;  %s681_s28 = scalar_lea.hbm %s942_s3, 512 }
 0x187   : > { %p678_p8 = scmp.ne.s32.totalorder %s897_s11, %s677_s26  ;;  %p682_p1 = scmp.lt.u32.totalorder %s897_s11, %s942_s3 }
 0x188   : > { %p683_p0 = scmp.lt.u32.totalorder %s681_s28, %s677_s26  ;;  %p685_p5 = scmp.lt.u32.totalorder %s677_s26, %s897_s11 }
 0x189   : > { %p679_p11 = pnand %p678_p8, %p953_p9 }
 0x18a   : > { %p684_p6 = por %p683_p0, %p682_p1 }
 0x18b   : > { %p680_p13 = pneg %p679_p11 }
 0x18c   : > { %p686_p10 = por %p685_p5, %p684_p6 }
 0x18e   : > { %p687_p12 = pnand %p686_p10, %p680_p13 }
 0x190   : > { %690 = shalt.err (!%p687_p12)
}
 0x191   : > { %568 = dma.vmem_to_hbm [thread:$0]  (%p953_p9), %s899_s8, 256, %s897_s11, %s463_s17  }
 0x192 PF: > { %p580_p2 = scmp.ge.s32.totalorder %s729_s15, 2  ;;  %s489_s4 = sand.u32 1, %s717_s12  }
 0x193   : > { %p954_p3 = scmp.ne.s32.totalorder %s947_s23, 0  ;;  %s490_s5 = scalar_lea.sflag [#allocation4], %s489_s4 }
 0x195   : > { %p575_p4 = pnand %p580_p2, %p954_p3 }
 0x197   : > { %712 = dma.done.wait (!%p575_p4), %s490_s5, 256  }
 0x198   : > { %714 = vsyncadd (!%p575_p4), %s490_s5, 4294967040  ;;  %p14_p7 = scmp.ge.s32.totalorder %s786_s18, 4   ;;  %s955_s12 = smov %s721_s13 }
 0x199   : > { %s956_s13 = smov %s725_s14  ;;  %s957_s14 = smov %s797_s21 }
 0x19a   : > { %s958_s15 = smov %s786_s18  ;;  %16 = sbr.rel (!%p14_p7) target bundleno = 4 (0x4), region = 72 }
 0x1a1   :  { %495 = vsyncpa [#allocation3], 1 }
 0x1a2   :  { %497 = vsyncpa [#allocation3 + $0x1], 1 }
 0x1a3   :  { %498 = vsyncpa [#allocation4], 1 }
 0x1a4   :  { %500 = vsyncpa [#allocation4 + $0x1], 1 }

</bundles_post_ra>
